<compile_context>
chip_gen: v5e
topology: v5e:2x2
jax: 0.10.0
libtpu: 0.0.40
codegen_flags: <defaults>
</compile_context>

<pallas_src>
import functools

import jax
import jax.numpy as jnp
from jax import lax
from jax.experimental import pallas as pl
from jax.experimental.pallas import tpu as pltpu


_LANE = 128
_ROW_TILE = 256                      # target rows / grid step for the 1x1 matmuls
_VMEM_LIMIT = 32 * 1024 * 1024       # fits every generation's scoped VMEM budget


def _round_up(c, m=_LANE):
    return ((c + m - 1) // m) * m


def _row_tile(m, target=_ROW_TILE):
    t = min(target, m)
    while t > 8 and m % t:
        t //= 2
    return t if t > 0 and m % t == 0 else m


# ---------------------------------------------------------------------------
# Pallas kernels
# ---------------------------------------------------------------------------
def _mm_bn_kernel(x_ref, w_ref, s_ref, b_ref, o_ref, *, relu):
    # (TM, Cin) @ (Cin, Cout) -> folded BN (+ ReLU).  bf16 in, f32 accumulate.
    y = jnp.dot(x_ref[...], w_ref[...], preferred_element_type=jnp.float32)
    y = y * s_ref[...] + b_ref[...]
    if relu:
        y = jnp.maximum(y, 0.0)
    o_ref[...] = y.astype(o_ref.dtype)


def _mm_bn_add_relu_kernel(x_ref, w_ref, s_ref, b_ref, short_ref, o_ref):
    # conv2 (1x1) + BN + identity residual + ReLU, fused.
    y = jnp.dot(x_ref[...], w_ref[...], preferred_element_type=jnp.float32)
    y = y * s_ref[...] + b_ref[...]
    y = y + short_ref[...].astype(jnp.float32)
    o_ref[...] = jnp.maximum(y, 0.0).astype(o_ref.dtype)


def _mm_bn_proj_add_relu_kernel(x_ref, w2_ref, s2_ref, b2_ref,
                                xs_ref, ws_ref, ss_ref, bs_ref, o_ref):
    # conv2 (1x1) + BN  and  shortcut 1x1 projection + BN, residual + ReLU,
    # all fused on the same M tile (no HBM round trip for `short`).
    y = jnp.dot(x_ref[...], w2_ref[...], preferred_element_type=jnp.float32)
    y = y * s2_ref[...] + b2_ref[...]
    s = jnp.dot(xs_ref[...], ws_ref[...], preferred_element_type=jnp.float32)
    s = s * ss_ref[...] + bs_ref[...]
    o_ref[...] = jnp.maximum(y + s, 0.0).astype(o_ref.dtype)


def _conv3x3_s1_kernel(x_ref, w_ref, s_ref, b_ref, o_ref, acc_ref, *, wp):
    # x_ref:   (Hflat, Cin)  flattened padded image (pad: top 1, bottom 2, l/r 1)
    # w_ref:   (9, Cin, Cout), tap (dh, dw) at index dh*3+dw
    # o_ref:   (Ho, Wo, Cout)
    # acc_ref: (Ho*Wp, Cout) f32 VMEM accumulator
    #
    # Each tap is one contiguous (statically offset) slab of the flat view, so
    # the 9 taps are 9 big MXU dots with no strided slices / reshapes.  Columns
    # [Wo, Wp) of each accumulator row are wrap-around garbage and are dropped
    # in the epilogue (Wp/Wo extra MXU columns, ~12%, is far cheaper than the
    # per-tap copies it removes).
    ho, wo, cout = o_ref.shape
    m = ho * wp
    for t in range(9):
        dh, dw = divmod(t, 3)
        start = dh * wp + dw
        contrib = jnp.dot(x_ref[start:start + m, :], w_ref[t],
                          preferred_element_type=jnp.float32)
        if t == 0:
            acc_ref[...] = contrib
        else:
            acc_ref[...] += contrib
    scale = s_ref[...]
    bias = b_ref[...]
    for i in range(ho):                       # epilogue: BN + ReLU, drop garbage cols
        row = acc_ref[i * wp:i * wp + wo, :]
        o_ref[i, :, :] = jnp.maximum(row * scale + bias, 0.0).astype(o_ref.dtype)


# ---------------------------------------------------------------------------
# Pallas wrappers
# ---------------------------------------------------------------------------
def conv1x1_bn(x2d, w, scale, bias, *, relu, out_dtype):
    m, cin = x2d.shape
    cout = w.shape[1]
    tm = _row_tile(m)
    return pl.pallas_call(
        functools.partial(_mm_bn_kernel, relu=relu),
        grid=(m // tm,),
        in_specs=[
            pl.BlockSpec((tm, cin), lambda i: (i, 0)),
            pl.BlockSpec((cin, cout), lambda i: (0, 0)),
            pl.BlockSpec((1, cout), lambda i: (0, 0)),
            pl.BlockSpec((1, cout), lambda i: (0, 0)),
        ],
        out_specs=pl.BlockSpec((tm, cout), lambda i: (i, 0)),
        out_shape=jax.ShapeDtypeStruct((m, cout), out_dtype),
        compiler_params=pltpu.CompilerParams(
            dimension_semantics=("parallel",),
            vmem_limit_bytes=_VMEM_LIMIT),
    )(x2d, w, scale.reshape(1, cout), bias.reshape(1, cout))


def conv1x1_bn_add_relu(y1_2d, w2, s2, b2, short_2d):
    m, cmid = y1_2d.shape
    c4 = w2.shape[1]
    tm = _row_tile(m)
    return pl.pallas_call(
        _mm_bn_add_relu_kernel,
        grid=(m // tm,),
        in_specs=[
            pl.BlockSpec((tm, cmid), lambda i: (i, 0)),
            pl.BlockSpec((cmid, c4), lambda i: (0, 0)),
            pl.BlockSpec((1, c4), lambda i: (0, 0)),
            pl.BlockSpec((1, c4), lambda i: (0, 0)),
            pl.BlockSpec((tm, c4), lambda i: (i, 0)),
        ],
        out_specs=pl.BlockSpec((tm, c4), lambda i: (i, 0)),
        out_shape=jax.ShapeDtypeStruct((m, c4), jnp.float32),
        compiler_params=pltpu.CompilerParams(
            dimension_semantics=("parallel",),
            vmem_limit_bytes=_VMEM_LIMIT),
    )(y1_2d, w2, s2.reshape(1, c4), b2.reshape(1, c4), short_2d)


def conv1x1_bn_proj_add_relu(y1_2d, w2, s2, b2, xs_2d, ws, ss, bs):
    m, cmid = y1_2d.shape
    c4 = w2.shape[1]
    cin = xs_2d.shape[1]
    tm = _row_tile(m)
    return pl.pallas_call(
        _mm_bn_proj_add_relu_kernel,
        grid=(m // tm,),
        in_specs=[
            pl.BlockSpec((tm, cmid), lambda i: (i, 0)),
            pl.BlockSpec((cmid, c4), lambda i: (0, 0)),
            pl.BlockSpec((1, c4), lambda i: (0, 0)),
            pl.BlockSpec((1, c4), lambda i: (0, 0)),
            pl.BlockSpec((tm, cin), lambda i: (i, 0)),
            pl.BlockSpec((cin, c4), lambda i: (0, 0)),
            pl.BlockSpec((1, c4), lambda i: (0, 0)),
            pl.BlockSpec((1, c4), lambda i: (0, 0)),
        ],
        out_specs=pl.BlockSpec((tm, c4), lambda i: (i, 0)),
        out_shape=jax.ShapeDtypeStruct((m, c4), jnp.float32),
        compiler_params=pltpu.CompilerParams(
            dimension_semantics=("parallel",),
            vmem_limit_bytes=_VMEM_LIMIT),
    )(y1_2d, w2, s2.reshape(1, c4), b2.reshape(1, c4),
      xs_2d, ws, ss.reshape(1, c4), bs.reshape(1, c4))


def conv3x3_bn_relu(x_nhwc, w9, scale, bias):
    # stride-1 3x3 conv, pad=1, fused folded-BN + ReLU; channels already lane-padded.
    # TODO(synk): add spatial (halo) row tiling for large H*W to bound the
    # per-step VMEM footprint (only batch-tiled here; fine at these sizes).
    n, h, w, cin = x_nhwc.shape
    cout = w9.shape[-1]
    wp = w + 2
    hflat = (h + 3) * wp           # +1 top, +2 bottom guard rows for the flat-slab reads
    xflat = jnp.pad(x_nhwc, ((0, 0), (1, 2), (1, 1), (0, 0))).reshape(n, hflat, cin)
    return pl.pallas_call(
        functools.partial(_conv3x3_s1_kernel, wp=wp),
        grid=(n,),
        in_specs=[
            pl.BlockSpec((None, hflat, cin), lambda i: (i, 0, 0)),
            pl.BlockSpec((9, cin, cout), lambda i: (0, 0, 0)),
            pl.BlockSpec((1, cout), lambda i: (0, 0)),
            pl.BlockSpec((1, cout), lambda i: (0, 0)),
        ],
        out_specs=pl.BlockSpec((None, h, w, cout), lambda i: (i, 0, 0, 0)),
        out_shape=jax.ShapeDtypeStruct((n, h, w, cout), jnp.bfloat16),
        scratch_shapes=[pltpu.VMEM((h * wp, cout), jnp.float32)],
        compiler_params=pltpu.CompilerParams(
            dimension_semantics=("parallel",),
            vmem_limit_bytes=_VMEM_LIMIT),
    )(xflat, w9, scale.reshape(1, cout), bias.reshape(1, cout))


def _avg_pool_ceil(x, k):
    """AvgPool2d(kernel=stride=k, ceil_mode=True), NHWC, divisible case."""
    kh, kw = k
    n, h, w, c = x.shape
    if h % kh or w % kw:
        # TODO(synk): ceil-mode partial windows (non-divisible H/W) not implemented.
        raise NotImplementedError("ceil-mode AvgPool with partial windows")
    xr = x.reshape(n, h // kh, kh, w // kw, kw, c).astype(jnp.float32)
    return xr.mean(axis=(2, 4)).astype(x.dtype)


# ---------------------------------------------------------------------------
# Parameters: deterministic synthetic weights + folded (inference) BatchNorm
# ---------------------------------------------------------------------------
def fold_bn(gamma, beta, mean, var, eps=1e-5):
    scale = gamma / jnp.sqrt(var + eps)
    return scale, beta - mean * scale


def init_raw_params(key, in_channels, out_channels):
    c4 = out_channels * 4
    keys = jax.random.split(key, 8)

    def conv_w(k, shape):                       # PyTorch OIHW
        fan_in = shape[1] * shape[2] * shape[3]
        return jax.random.normal(k, shape, jnp.float32) / jnp.sqrt(float(fan_in))

    def bn(k, c):
        k1, k2, k3, k4 = jax.random.split(k, 4)
        gamma = jax.random.uniform(k1, (c,), jnp.float32, 0.5, 1.5)
        beta = 0.1 * jax.random.normal(k2, (c,), jnp.float32)
        mean = 0.1 * jax.random.normal(k3, (c,), jnp.float32)
        var = jax.random.uniform(k4, (c,), jnp.float32, 0.5, 1.5)
        return fold_bn(gamma, beta, mean, var)

    w0 = conv_w(keys[0], (out_channels, in_channels, 1, 1))
    w1 = conv_w(keys[1], (out_channels, out_channels, 3, 3))
    w2 = conv_w(keys[2], (c4, out_channels, 1, 1))
    ws = conv_w(keys[3], (c4, in_channels, 1, 1))
    s0, b0 = bn(keys[4], out_channels)
    s1, b1 = bn(keys[5], out_channels)
    s2, b2 = bn(keys[6], c4)
    ss, bs = bn(keys[7], c4)
    return {
        "w0": jnp.transpose(w0[:, :, 0, 0]),      # (Cin, Cmid)
        "w1": jnp.transpose(w1, (2, 3, 1, 0)),    # (3, 3, Cmid, Cmid) HWIO
        "w2": jnp.transpose(w2[:, :, 0, 0]),      # (Cmid, C4)
        "ws": jnp.transpose(ws[:, :, 0, 0]),      # (Cin, C4)
        "s0": s0, "b0": b0, "s1": s1, "b1": b1,
        "s2": s2, "b2": b2, "ss": ss, "bs": bs,
    }


def prepare_params(raw):
    """Zero-pad all channel axes to multiples of 128 (lane-dense) and cast the
    weights to bf16 for the MXU; folded BN scale/bias stay f32 (padded with 0)."""
    cin, cmid = raw["w0"].shape
    c4 = raw["w2"].shape[1]
    cin_p, cmid_p, c4_p = _round_up(cin), _round_up(cmid), _round_up(c4)

    def pad2(a, r, c):
        return jnp.pad(a, ((0, r - a.shape[0]), (0, c - a.shape[1])))

    def pad1(a, c):
        return jnp.pad(a, (0, c - a.shape[0]))

    w1 = jnp.pad(raw["w1"], ((0, 0), (0, 0), (0, cmid_p - cmid), (0, cmid_p - cmid)))
    return {
        "w0": pad2(raw["w0"], cin_p, cmid_p).astype(jnp.bfloat16),
        "w1": w1.reshape(9, cmid_p, cmid_p).astype(jnp.bfloat16),
        "w2": pad2(raw["w2"], cmid_p, c4_p).astype(jnp.bfloat16),
        "ws": pad2(raw["ws"], cin_p, c4_p).astype(jnp.bfloat16),
        "s0": pad1(raw["s0"], cmid_p), "b0": pad1(raw["b0"], cmid_p),
        "s1": pad1(raw["s1"], cmid_p), "b1": pad1(raw["b1"], cmid_p),
        "s2": pad1(raw["s2"], c4_p), "b2": pad1(raw["b2"], c4_p),
        "ss": pad1(raw["ss"], c4_p), "bs": pad1(raw["bs"], c4_p),
        "dims": (cin, cmid, c4, cin_p, cmid_p, c4_p),
    }


# ---------------------------------------------------------------------------
# BottleneckBlock forward (Pallas) and a pure-JAX reference
# ---------------------------------------------------------------------------
def bottleneck_forward(x_nchw, params, *, stride=(1, 1), shortcut=False, if_first=False):
    if isinstance(stride, int):
        stride = (stride, stride)
    sh, sw = stride
    cin, cmid, c4, cin_p, cmid_p, c4_p = params["dims"]

    # Boundary: NCHW -> NHWC, lane-pad channels, cast to bf16 (one fused XLA chain).
    # TODO(synk): in a full backbone keep activations NHWC / lane-padded end-to-end
    # and drop these boundary transposes entirely.
    x = jnp.transpose(x_nchw, (0, 2, 3, 1))
    n, h, w, _ = x.shape
    x_p = jnp.pad(x, ((0, 0), (0, 0), (0, 0), (0, cin_p - cin))).astype(jnp.bfloat16)

    # conv0: 1x1 + BN + ReLU (gridded matmul)
    y0 = conv1x1_bn(x_p.reshape(n * h * w, cin_p), params["w0"], params["s0"],
                    params["b0"], relu=True, out_dtype=jnp.bfloat16)
    y0 = y0.reshape(n, h, w, cmid_p)

    # conv1: 3x3 + BN + ReLU.  Stride > 1 reuses the stride-1 kernel + subsample.
    # TODO(synk): dedicated strided 3x3 kernel (phase decomposition) would avoid
    # the 1/(sh*sw) wasted MXU work and this XLA strided slice.
    y1 = conv3x3_bn_relu(y0, params["w1"], params["s1"], params["b1"])
    if stride != (1, 1):
        y1 = y1[:, ::sh, ::sw, :]
    _, ho, wo, _ = y1.shape
    y1_2d = y1.reshape(n * ho * wo, cmid_p)

    if shortcut:
        # Identity shortcut (requires in_channels == 4*out_channels, stride == 1).
        short_2d = x_p.reshape(n * h * w, cin_p)
        out_2d = conv1x1_bn_add_relu(y1_2d, params["w2"], params["s2"],
                                     params["b2"], short_2d)
    else:
        if not if_first and sh != 1:
            xs = _avg_pool_ceil(x_p, stride)            # is_vd_mode shortcut
        else:
            xs = x_p[:, ::sh, ::sw, :]                  # plain strided 1x1 projection
        out_2d = conv1x1_bn_proj_add_relu(
            y1_2d, params["w2"], params["s2"], params["b2"],
            xs.reshape(n * ho * wo, cin_p), params["ws"], params["ss"], params["bs"])

    out = out_2d.reshape(n, ho, wo, c4_p)[:, :, :, :c4]
    return jnp.transpose(out, (0, 3, 1, 2))             # back to NCHW, f32


def ref_forward(x_nchw, raw, *, stride=(1, 1), shortcut=False, if_first=False,
                compute_dtype=jnp.float32):
    """Pure-JAX reference.  compute_dtype=bfloat16 mirrors the kernel's storage
    precision (bf16 conv inputs, f32 accumulation / BN / residual)."""
    if isinstance(stride, int):
        stride = (stride, stride)
    cd = compute_dtype
    x = jnp.transpose(x_nchw, (0, 2, 3, 1)).astype(jnp.float32)

    def conv(xin, w_hwio, strides, pad):
        return lax.conv_general_dilated(
            xin.astype(cd), w_hwio.astype(cd), strides,
            [(pad, pad), (pad, pad)],
            dimension_numbers=("NHWC", "HWIO", "NHWC"),
            preferred_element_type=jnp.float32)

    w0 = raw["w0"][None, None]
    w2 = raw["w2"][None, None]
    ws = raw["ws"][None, None]
    y0 = jnp.maximum(conv(x, w0, (1, 1), 0) * raw["s0"] + raw["b0"], 0.0)
    y1 = jnp.maximum(conv(y0, raw["w1"], stride, 1) * raw["s1"] + raw["b1"], 0.0)
    y2 = conv(y1, w2, (1, 1), 0) * raw["s2"] + raw["b2"]
    if shortcut:
        short = x.astype(cd).astype(jnp.float32)
    else:
        if not if_first and stride[0] != 1:
            xs = _avg_pool_ceil(x.astype(cd), stride)
        else:
            xs = x[:, ::stride[0], ::stride[1], :]
        short = conv(xs, ws, (1, 1), 0) * raw["ss"] + raw["bs"]
    out = jnp.maximum(short + y2, 0.0)
    return jnp.transpose(out, (0, 3, 1, 2))


if __name__ == "__main__":
    key = jax.random.PRNGKey(0)
    kx, kp = jax.random.split(key)

    in_channels, out_channels = 16, 4
    x = jax.random.normal(kx, (2, in_channels, 16, 16), jnp.float32)   # NCHW

    cases = [
        dict(stride=(1, 1), shortcut=False, if_first=True),    # plain projection shortcut
        dict(stride=(2, 2), shortcut=False, if_first=False),   # is_vd_mode (avgpool) shortcut
        dict(stride=(1, 1), shortcut=True, if_first=False),    # identity shortcut (Cin == 4*Cout)
    ]

    for i, cfg in enumerate(cases):
        raw = init_raw_params(jax.random.fold_in(kp, i), in_channels, out_channels)
        params = prepare_params(raw)

        out = bottleneck_forward(x, params, **cfg)
        out = jax.block_until_ready(out)

        ref_bf16 = ref_forward(x, raw, compute_dtype=jnp.bfloat16, **cfg)
        ref_f32 = ref_forward(x, raw, compute_dtype=jnp.float32, **cfg)
        assert out.shape == ref_f32.shape, (out.shape, ref_f32.shape)

        d_bf16 = jnp.abs(out - ref_bf16)
        d_f32 = jnp.abs(out - ref_f32)
        assert float(jnp.max(d_bf16)) < 7.5e-2, \
            f"case {i}: max mismatch vs bf16-mirror ref: {float(jnp.max(d_bf16))}"
        assert float(jnp.mean(d_bf16)) < 1e-3, \
            f"case {i}: mean mismatch vs bf16-mirror ref: {float(jnp.mean(d_bf16))}"
        assert float(jnp.max(d_f32)) < 2.5e-1, \
            f"case {i}: max mismatch vs f32 ref: {float(jnp.max(d_f32))}"
        assert float(jnp.mean(d_f32)) < 4e-2, \
            f"case {i}: mean mismatch vs f32 ref: {float(jnp.mean(d_f32))}"

    print("KERNEL_OK")
</pallas_src>

<mosaic_0001>
module attributes {stable_mosaic.version = 11 : i64} {
  func.func @_mm_bn_kernel(%arg0: i32, %arg1: memref<256x128xbf16, #tpu.memory_space<vmem>>, %arg2: memref<128x128xbf16, #tpu.memory_space<vmem>>, %arg3: memref<1x128xf32, #tpu.memory_space<vmem>>, %arg4: memref<1x128xf32, #tpu.memory_space<vmem>>, %arg5: memref<256x128xbf16, #tpu.memory_space<vmem>>) attributes {dimension_semantics = [#tpu.dimension_semantics<parallel>], iteration_bounds = array<i64: 2>, scalar_prefetch = 0 : i64, scratch_operands = 0 : i64, tpu.core_type = #tpu.core_type<tc>, window_params = [{transform_indices = @transform_0, window_bounds = array<i64: 256, 128>}, {pipeline_mode = #tpu.pipeline_mode<synchronous>, transform_indices = @transform_1, window_bounds = array<i64: 128, 128>}, {pipeline_mode = #tpu.pipeline_mode<synchronous>, transform_indices = @transform_2, window_bounds = array<i64: 1, 128>}, {pipeline_mode = #tpu.pipeline_mode<synchronous>, transform_indices = @transform_3, window_bounds = array<i64: 1, 128>}, {transform_indices = @transform_4, window_bounds = array<i64: 256, 128>}]} {
    %c0 = arith.constant 0 : index
    %c0_0 = arith.constant 0 : index
    %0 = vector.load %arg1[%c0, %c0_0] : memref<256x128xbf16, #tpu.memory_space<vmem>>, vector<256x128xbf16>
    %c0_1 = arith.constant 0 : index
    %c0_2 = arith.constant 0 : index
    %1 = vector.load %arg2[%c0_1, %c0_2] : memref<128x128xbf16, #tpu.memory_space<vmem>>, vector<128x128xbf16>
    %cst = arith.constant dense<0.000000e+00> : vector<256x128xf32>
    %2 = tpu.matmul %0, %1, %cst {dimension_numbers = #tpu.dot_dimension_numbers<[1], [0], [0], [1], [0, 0, 1, 1], [], []>} : vector<256x128xbf16>, vector<128x128xbf16>, vector<256x128xf32> -> vector<256x128xf32>
    %c0_3 = arith.constant 0 : index
    %c0_4 = arith.constant 0 : index
    %3 = vector.load %arg3[%c0_3, %c0_4] : memref<1x128xf32, #tpu.memory_space<vmem>>, vector<1x128xf32>
    %4 = vector.broadcast %3 : vector<1x128xf32> to vector<256x128xf32>
    %5 = arith.mulf %2, %4 : vector<256x128xf32>
    %c0_5 = arith.constant 0 : index
    %c0_6 = arith.constant 0 : index
    %6 = vector.load %arg4[%c0_5, %c0_6] : memref<1x128xf32, #tpu.memory_space<vmem>>, vector<1x128xf32>
    %7 = vector.broadcast %6 : vector<1x128xf32> to vector<256x128xf32>
    %8 = arith.addf %5, %7 : vector<256x128xf32>
    %cst_7 = arith.constant 0.000000e+00 : f32
    %9 = vector.broadcast %cst_7 : f32 to vector<256x128xf32>
    %10 = arith.maximumf %8, %9 : vector<256x128xf32>
    %11 = arith.truncf %10 : vector<256x128xf32> to vector<256x128xbf16>
    %c0_8 = arith.constant 0 : index
    %c0_9 = arith.constant 0 : index
    %12 = vector.load %arg5[%c0_8, %c0_9] : memref<256x128xbf16, #tpu.memory_space<vmem>>, vector<256x128xbf16>
    tpu.vector_store %arg5[%c0_8, %c0_9], %11 {strides = array<i32>} : memref<256x128xbf16, #tpu.memory_space<vmem>>, vector<256x128xbf16>,
    return
  }
  func.func @transform_0(%arg0: i32) -> (i32, i32) {
    %c0_i32 = arith.constant 0 : i32
    %c0_i32_0 = arith.constant 0 : i32
    return %arg0, %c0_i32 : i32, i32
  }
  func.func @transform_1(%arg0: i32) -> (i32, i32) {
    %c0_i32 = arith.constant 0 : i32
    %c0_i32_0 = arith.constant 0 : i32
    %c0_i32_1 = arith.constant 0 : i32
    return %c0_i32, %c0_i32_0 : i32, i32
  }
  func.func @transform_2(%arg0: i32) -> (i32, i32) {
    %c0_i32 = arith.constant 0 : i32
    %c0_i32_0 = arith.constant 0 : i32
    %c0_i32_1 = arith.constant 0 : i32
    return %c0_i32, %c0_i32_0 : i32, i32
  }
  func.func @transform_3(%arg0: i32) -> (i32, i32) {
    %c0_i32 = arith.constant 0 : i32
    %c0_i32_0 = arith.constant 0 : i32
    %c0_i32_1 = arith.constant 0 : i32
    return %c0_i32, %c0_i32_0 : i32, i32
  }
  func.func @transform_4(%arg0: i32) -> (i32, i32) {
    %c0_i32 = arith.constant 0 : i32
    %c0_i32_0 = arith.constant 0 : i32
    return %arg0, %c0_i32 : i32, i32
  }
}

</mosaic_0001>

<bundles_post_ra>
// kernel: tpu_custom_call.1
= control target key start
LH: loop header
LB: loop body
LE: loop exit
PB: predicated region body
PF: predicated region fallthrough
CT: control target
= control target key end

     0   :  { %9 = vsyncpa [#allocation3], 0  ;;  %s1526_s0 = inlined_call_operand.hbm [shape: bf16[512,128], index: 0, kind: input, shape index: {}]   ;;  %s1527_s1 = inlined_call_operand.hbm [shape: bf16[128,128], index: 1, kind: input, shape index: {}]   ;;  %s1528_s2 = inlined_call_operand.vmem [shape: f32[1,128], index: 2, kind: input, shape index: {}]   ;;  %s1529_s3 = inlined_call_operand.vmem [shape: f32[1,128], index: 3, kind: input, shape index: {}]   ;;  %s1530_s4 = inlined_call_operand.hbm [shape: bf16[512,128], index: 4, kind: output, shape index: {}]  }
   0x1   :  { %11 = vsyncpa [#allocation3 + $0x1], 0 }
   0x2   :  { %12 = vsyncpa [#allocation6], 0 }
   0x3   :  { %13 = vsyncpa [#allocation4], 0 }
   0x4   :  { %15 = vsyncpa [#allocation4 + $0x1], 0  ;;  %s1267_s15 = smov 0   ;;  %s1269_s16 = smov 0  }
   0x5   :  { %s1271_s17 = smov 0   ;;  %s1273_s18 = smov 0  }
   0x6 LB: > { %s1288_s19 = sadd.s32 4294967295, %s1235_s18   ;;  %s785_s20 = sadd.s32 4294967294, %s1235_s18   ;;  %s1235_s18 = sphi %s1273_s18, %s1540_s18   ;;  %s1231_s17 = sphi %s1271_s17, %s1539_s17   ;;  %s1227_s16 = sphi %s1269_s16, %s1538_s16   ;;  %s1223_s15 = sphi %s1267_s15, %s1537_s15  }
   0x7   : > { %p41_p0 = scmp.ne.s32.totalorder %s1227_s16, %s1223_s15  ;;  %p42_p1 = scmp.eq.s32.totalorder %s1288_s19, 0 }
   0x8   : > { %p128_p2 = scmp.eq.s32.totalorder %s1288_s19, 1  ;;  %p134_p3 = scmp.eq.s32.totalorder %s785_s20, 1 }
   0x9   : > { %p1297_p4 = por %p42_p1, %p41_p0  ;;  %p786_p5 = scmp.ge.s32.totalorder %s1235_s18, 1 }
   0xa   : > { %p1302_p6 = por %p134_p3, %p41_p0  ;;  %p141_p7 = scmp.lt.s32.totalorder %s1235_s18, 3 }
   0xb   : > { %s152_s25 = sshll.u32 %s1527_s1, 4  ;;  %s1237_s27 = smov [#allocation5]   ;;  %s153_s25 = int_to_ptr.hbm [resolvable:$true] %s152_s25 }
   0xc   : > { %p1310_p8 = pnand %p786_p5, %p141_p7  ;;  %s154_s28 = sshll.u32 %s1237_s27, 4  ;;  %s155_s28 = int_to_ptr.vmem [resolvable:$true] %s154_s28 }
   0xd   : > { %s1320_s29 = sadd.s32 1, %s1235_s18   ;;  %s1238_s30 = smov 64  }
   0xe   : > { %p1050_p9 = pneg %p1310_p8  ;;  %s1239_s5 = smov 4  }
   0xf   : > { %s25_s6 = ssub.s32 %s1235_s18, %s1320_s29  ;;  %s28_s7 = sadd.s32 1, %s1231_s17 }
  0x10   : > { %p1051_p10 = pnand %p1050_p9, %p42_p1  ;;  %p26_p12 = scmp.eq.s32.totalorder %s25_s6, 0 }
  0x11   : > { %p35_p13 = scmp.ne.s32.totalorder %s1231_s17, %s1227_s16  ;;  %p36_p0 = scmp.eq.s32.totalorder %s1235_s18, 0 }
  0x12   : > { %1053 = dma.hbm_to_vmem [thread:$0]  (!%p1051_p10), %s153_s25, 1024, %s155_s28, [#allocation6], %s1238_s30, %s1238_s30, %s1239_s5  }
  0x13   : > { %s1332_s8 = scalar_select %p26_p12, %s1231_s17, %s28_s7  }
  0x14   : > { %p1336_p3 = por %p128_p2, %p35_p13  ;;  %p1063_p5 = scmp.lt.s32.totalorder %s1235_s18, 2 }
  0x15   : > { %s174_s10 = sand.u32 1, %s1231_s17   ;;  %s897_s11 = sshll.u32 %s1235_s18, 7 }
  0x16   : > { %p37_p7 = por %p36_p0, %p35_p13  ;;  %s789_s12 = sshll.u32 %s174_s10, 7 }
  0x17   : > { %s183_s20 = scalar_lea.hbm %s1526_s0, %s897_s11  ;;  %s178_s24 = scalar_lea.vmem [#allocation2], %s789_s12 }
  0x18   : > { %s184_s23 = sshll.u32 %s183_s20, 4  ;;  %s186_s25 = sshll.u32 %s178_s24, 4  ;;  %s185_s23 = int_to_ptr.hbm [resolvable:$true] %s184_s23  ;;  %s187_s25 = int_to_ptr.vmem [resolvable:$true] %s186_s25 }
  0x19   : > { %p1346_p9 = pnand %p1063_p5, %p37_p7  ;;  %s175_s28 = scalar_lea.sflag [#allocation3], %s174_s10 }
  0x1a   : > { %s1135_s6 = sshra.s32 %s185_s23, 4  ;;  %s1142_s12 = scalar_lea.hbm %s1526_s0, 256  ;;  %s1136_s6 = int_to_ptr.hbm [resolvable:$true] %s1135_s6 }
  0x1b   : > { %s1137_s7 = scalar_lea.hbm %s1136_s6, 128  ;;  %p1139_p10 = pneg %p1346_p9 }
  0x1c   : > { %p1138_p2 = scmp.ne.s32.totalorder %s1136_s6, %s1137_s7  ;;  %p1143_p0 = scmp.lt.s32.totalorder %s1136_s6, %s1526_s0 }
  0x1d   : > { %p1144_p5 = scmp.lt.s32.totalorder %s1142_s12, %s1137_s7 }
  0x1e   : > { %p1140_p12 = pnand %p1139_p10, %p1138_p2 }
  0x1f   : > { %p1145_p7 = por %p1144_p5, %p1143_p0 }
  0x20   : > { %p1141_p13 = pneg %p1140_p12 }
  0x22   : > { %p1146_p11 = pnand %p1145_p7, %p1141_p13 }
  0x24   : > { %1149 = shalt.err (!%p1146_p11)
}
  0x25   : > { %1057 = dma.hbm_to_vmem [thread:$0]  (!%p1346_p9), %s185_s23, 2048, %s187_s25, %s175_s28, %s1238_s30, %s1238_s30, %s1239_s5  }
  0x26   : > { %198 = sbr.rel (%p1310_p8) target bundleno = 280 (0x118), region = 36  ;;  %s1366_s10 = sand.u32 (!%p1310_p8), 1, %s1227_s16  }
  0x27   : > { %s793_s24 = sshll.u32 (!%p1310_p8), %s1366_s10, 7  ;;  %s201_s6 = scalar_lea.sflag (!%p1310_p8), [#allocation3], %s1366_s10 }
  0x28   : > { %s1372_s7 = scalar_lea.vmem (!%p1310_p8), [#allocation2], %s793_s24 }
  0x2b   : > { %1210 = dma.done.wait (%p1297_p4), %s201_s6, 2048  }
  0x2c   : > { %1212 = vsyncadd (%p1297_p4), %s201_s6, 4294965248 }
  0x2d   : > { %1214 = dma.done.wait (%p42_p1), [#allocation6], 1024  }
  0x2e   : > { %1216 = vsyncadd (%p42_p1), [#allocation6], 4294966272  ;;  %v921_v0 = vld [vmem:[#allocation5 + $0x38] sm:$0xff]  ;;  %v920_v1 = vld [vmem:[#allocation5 + $0x30] sm:$0xff]  ;;  %s1424_s23 = scalar_lea.vmem [#allocation7], %s793_s24  ;;  %s922_s25 = sshll.u32 %s1288_s19, 7 }
  0x2f   : > { %429 = vmatpush.bf16.msra.mxu0 %v921_v0  ;;  %1018 = vmatpush.bf16.msra.mxu1 %v921_v0  ;;  %v919_v2 = vld [vmem:[#allocation5 + $0x28] sm:$0xff]  ;;  %v918_v3 = vld [vmem:[#allocation5 + $0x20] sm:$0xff]  ;;  %v917_v4 = vld [vmem:[#allocation5 + $0x18] sm:$0xff]  ;;  %s698_s11 = scalar_lea.hbm %s1530_s4, %s922_s25  ;;  %s699_s19 = sshll.u32 %s1424_s23, 4  ;;  %s700_s19 = int_to_ptr.vmem [resolvable:$true] %s699_s19 }
  0x30   : > { %1019 = vmatpush.bf16.msra.mxu2 %v921_v0  ;;  %1020 = vmatpush.bf16.msra.mxu3 %v921_v0  ;;  %v916_v5 = vld [vmem:[#allocation5 + $0x10] sm:$0xff]  ;;  %v915_v6 = vld [vmem:[#allocation5 + $0x8] sm:$0xff]  ;;  %v914_v7 = vld [vmem:[#allocation5] sm:$0xff]  ;;  %s701_s13 = sshll.u32 %s698_s11, 4  ;;  %s687_s12 = scalar_lea.sflag [#allocation4], %s1366_s10  ;;  %s702_s13 = int_to_ptr.hbm [resolvable:$true] %s701_s13 }
  0x31   : > { %v898_v8 = vld [vmem:[%s1372_s7] sm:$0xff]  ;;  %v899_v12 = vld [vmem:[%s1372_s7 + $0x8] sm:$0xff]  ;;  %v900_v16 = vld [vmem:[%s1372_s7 + $0x10] sm:$0xff]  ;;  %s1179_s14 = sshra.s32 %s702_s13, 4  ;;  %s1180_s14 = int_to_ptr.hbm [resolvable:$true] %s1179_s14 }
  0x32   : > { %v902_v9 = vld [vmem:[%s1372_s7 + $0x20] sm:$0xff]  ;;  %v903_v13 = vld [vmem:[%s1372_s7 + $0x28] sm:$0xff]  ;;  %v904_v17 = vld [vmem:[%s1372_s7 + $0x30] sm:$0xff]  ;;  %s1181_s20 = scalar_lea.hbm %s1180_s14, 128  ;;  %p1186_p11 = scmp.lt.s32.totalorder %s1180_s14, %s1530_s4 }
  0x33   : > { %430 = vmatpush.bf16.msra.mxu0 %v920_v1  ;;  %1021 = vmatpush.bf16.msra.mxu1 %v920_v1  ;;  %v906_v10 = vld [vmem:[%s1372_s7 + $0x40] sm:$0xff]  ;;  %v907_v14 = vld [vmem:[%s1372_s7 + $0x48] sm:$0xff]  ;;  %v908_v18 = vld [vmem:[%s1372_s7 + $0x50] sm:$0xff]  ;;  %p1182_p1 = scmp.ne.s32.totalorder %s1180_s14, %s1181_s20 }
  0x34   : > { %1022 = vmatpush.bf16.msra.mxu2 %v920_v1  ;;  %1023 = vmatpush.bf16.msra.mxu3 %v920_v1  ;;  %v910_v11 = vld [vmem:[%s1372_s7 + $0x60] sm:$0xff]  ;;  %v911_v15 = vld [vmem:[%s1372_s7 + $0x68] sm:$0xff]  ;;  %v912_v19 = vld [vmem:[%s1372_s7 + $0x70] sm:$0xff] }
  0x35   : > { %v901_v20 = vld [vmem:[%s1372_s7 + $0x18] sm:$0xff]  ;;  %v1401_v26 = vld [vmem:[%s1528_s2] ss:$0 sm:$0xff]  ;;  %p1183_p4 = pnand %p1182_p1, %p1336_p3 }
  0x36   : > { %v905_v21 = vld [vmem:[%s1372_s7 + $0x38] sm:$0xff]  ;;  %v1407_v28 = vld [vmem:[%s1529_s3] ss:$0 sm:$0xff] }
  0x37   : > { %431 = vmatpush.bf16.msra.mxu0 %v919_v2  ;;  %1024 = vmatpush.bf16.msra.mxu1 %v919_v2  ;;  %v909_v22 = vld [vmem:[%s1372_s7 + $0x58] sm:$0xff]  ;;  %p1184_p8 = pneg %p1183_p4 }
  0x38   : > { %1025 = vmatpush.bf16.msra.mxu2 %v919_v2  ;;  %1026 = vmatpush.bf16.msra.mxu3 %v919_v2  ;;  %v913_v23 = vld [vmem:[%s1372_s7 + $0x78] sm:$0xff]  ;;  %s1185_s7 = scalar_lea.hbm %s1530_s4, 256 }
  0x39   : > { %p1187_p9 = scmp.lt.s32.totalorder %s1185_s7, %s1181_s20 }
  0x3b   : > { %432 = vmatpush.bf16.msra.mxu0 %v918_v3  ;;  %1027 = vmatpush.bf16.msra.mxu1 %v918_v3  ;;  %p1188_p2 = por %p1187_p9, %p1186_p11 }
  0x3c   : > { %1028 = vmatpush.bf16.msra.mxu2 %v918_v3  ;;  %1029 = vmatpush.bf16.msra.mxu3 %v918_v3 }
  0x3d   : > { %p1189_p10 = pnand %p1188_p2, %p1184_p8 }
  0x3f   : > { %433 = vmatpush.bf16.msra.mxu0 %v917_v4  ;;  %1030 = vmatpush.bf16.msra.mxu1 %v917_v4 }
  0x40   : > { %1031 = vmatpush.bf16.msra.mxu2 %v917_v4  ;;  %1032 = vmatpush.bf16.msra.mxu3 %v917_v4 }
  0x43   : > { %434 = vmatpush.bf16.msra.mxu0 %v916_v5  ;;  %1033 = vmatpush.bf16.msra.mxu1 %v916_v5 }
  0x44   : > { %1034 = vmatpush.bf16.msra.mxu2 %v916_v5  ;;  %1035 = vmatpush.bf16.msra.mxu3 %v916_v5 }
  0x47   : > { %435 = vmatpush.bf16.msra.mxu0 %v915_v6  ;;  %1036 = vmatpush.bf16.msra.mxu1 %v915_v6 }
  0x48   : > { %1037 = vmatpush.bf16.msra.mxu2 %v915_v6  ;;  %1038 = vmatpush.bf16.msra.mxu3 %v915_v6 }
  0x4b   : > { %436 = vmatpush.bf16.msra.mxu0 %v914_v7  ;;  %1039 = vmatpush.bf16.msra.mxu1 %v914_v7 }
  0x4c   : > { %1040 = vmatpush.bf16.msra.mxu2 %v914_v7  ;;  %1041 = vmatpush.bf16.msra.mxu3 %v914_v7 }
  0x4e   : > { %437 = vmatmul.bf16.vlgmr.msra.gmra.mxu0 %v898_v8  ;;  %457 = vmatmul.bf16.vlgmr.msra.gmra.mxu1 %v902_v9 }
  0x4f   : > { %477 = vmatmul.bf16.vlgmr.msra.gmra.mxu2 %v906_v10  ;;  %497 = vmatmul.bf16.vlgmr.msra.gmra.mxu3 %v910_v11 }
  0x5e   : > { %442 = vmatmul.bf16.gmra.mxu0 %v899_v12  ;;  %462 = vmatmul.bf16.gmra.mxu1 %v903_v13 }
  0x5f   : > { %482 = vmatmul.bf16.gmra.mxu2 %v907_v14  ;;  %502 = vmatmul.bf16.gmra.mxu3 %v911_v15 }
  0x6e   : > { %447 = vmatmul.bf16.gmra.mxu0 %v900_v16  ;;  %467 = vmatmul.bf16.gmra.mxu1 %v904_v17 }
  0x6f   : > { %487 = vmatmul.bf16.gmra.mxu2 %v908_v18  ;;  %507 = vmatmul.bf16.gmra.mxu3 %v912_v19 }
  0x7e   : > { %452 = vmatmul.bf16.gmra.mxu0 %v901_v20  ;;  %472 = vmatmul.bf16.gmra.mxu1 %v905_v21 }
  0x7f   : > { %492 = vmatmul.bf16.gmra.mxu2 %v909_v22  ;;  %512 = vmatmul.bf16.gmra.mxu3 %v913_v23 }
  0xcb   : > { %v438_v24 = vpop.f32.mrf.mxu0  ;;  %v458_v25 = vpop.f32.mrf.mxu1 }
  0xcc   : > { %v522_v27 = vmul.f32 %v1401_v26, %v438_v24  ;;  %v530_v29 = vmul.f32 %v1401_v26, %v458_v25 }
  0xce   : > { %v558_v34 = vadd.f32 %v1407_v28, %v522_v27  ;;  %v566_v35 = vadd.f32 %v1407_v28, %v530_v29 }
  0xd0   : > { %v590_v42 = vmax.f32 %v558_v34, 0.0  ;;  %v598_v43 = vmax.f32 %v566_v35, 0.0 }
  0xd2   : > { %v478_v30 = vpop.f32.mrf.mxu2  ;;  %v498_v31 = vpop.f32.mrf.mxu3 }
  0xd3   : > { %v440_v32 = vpop.f32.mrf.mxu0  ;;  %v460_v33 = vpop.f32.mrf.mxu1  ;;  %v538_v40 = vmul.f32 %v1401_v26, %v478_v30  ;;  %v546_v41 = vmul.f32 %v1401_v26, %v498_v31 }
  0xd4   : > { %v523_v36 = vmul.f32 %v1401_v26, %v440_v32  ;;  %v531_v37 = vmul.f32 %v1401_v26, %v460_v33 }
  0xd5   : > { %v574_v50 = vadd.f32 %v1407_v28, %v538_v40  ;;  %v582_v51 = vadd.f32 %v1407_v28, %v546_v41 }
  0xd6   : > { %v559_v38 = vadd.f32 %v1407_v28, %v523_v36  ;;  %v567_v39 = vadd.f32 %v1407_v28, %v531_v37 }
  0xd7   : > { %v606_v58 = vmax.f32 %v574_v50, 0.0  ;;  %v614_v59 = vmax.f32 %v582_v51, 0.0 }
  0xd8   : > { %v591_v44 = vmax.f32 %v559_v38, 0.0  ;;  %v599_v45 = vmax.f32 %v567_v39, 0.0 }
  0xda   : > { %v926_v46 = vpack.c.bf16 %v591_v44, %v590_v42  ;;  %v946_v47 = vpack.c.bf16 %v599_v45, %v598_v43  ;;  %v480_v48 = vpop.f32.mrf.mxu2  ;;  %v500_v49 = vpop.f32.mrf.mxu3 }
  0xdb   : > { %v539_v52 = vmul.f32 %v1401_v26, %v480_v48  ;;  %v547_v53 = vmul.f32 %v1401_v26, %v500_v49  ;;  %v443_v54 = vpop.f32.mrf.mxu0  ;;  %v463_v55 = vpop.f32.mrf.mxu1 }
  0xdc   : > { %927 = vst [vmem:[%s1424_s23] sm:$0xff] %v926_v46   ;;  %v524_v62 = vmul.f32 %v1401_v26, %v443_v54  ;;  %v532_v63 = vmul.f32 %v1401_v26, %v463_v55 }
  0xdd   : > { %1006 = vst [vmem:[%s1424_s23 + $0x20] sm:$0xff] %v946_v47   ;;  %v575_v56 = vadd.f32 %v1407_v28, %v539_v52  ;;  %v583_v57 = vadd.f32 %v1407_v28, %v547_v53 }
  0xde   : > { %v560_v6 = vadd.f32 %v1407_v28, %v524_v62  ;;  %v568_v7 = vadd.f32 %v1407_v28, %v532_v63 }
  0xdf   : > { %v607_v60 = vmax.f32 %v575_v56, 0.0  ;;  %v615_v61 = vmax.f32 %v583_v57, 0.0 }
  0xe0   : > { %v592_v14 = vmax.f32 %v560_v6, 0.0  ;;  %v600_v15 = vmax.f32 %v568_v7, 0.0 }
  0xe1   : > { %v966_v0 = vpack.c.bf16 %v607_v60, %v606_v58  ;;  %v986_v1 = vpack.c.bf16 %v615_v61, %v614_v59 }
  0xe2   : > { %v483_v2 = vpop.f32.mrf.mxu2  ;;  %v503_v3 = vpop.f32.mrf.mxu3 }
  0xe3   : > { %1010 = vst [vmem:[%s1424_s23 + $0x40] sm:$0xff] %v966_v0   ;;  %v445_v4 = vpop.f32.mrf.mxu0  ;;  %v465_v5 = vpop.f32.mrf.mxu1  ;;  %v540_v12 = vmul.f32 %v1401_v26, %v483_v2  ;;  %v548_v13 = vmul.f32 %v1401_v26, %v503_v3 }
  0xe4   : > { %1014 = vst [vmem:[%s1424_s23 + $0x60] sm:$0xff] %v986_v1   ;;  %v525_v8 = vmul.f32 %v1401_v26, %v445_v4  ;;  %v533_v9 = vmul.f32 %v1401_v26, %v465_v5 }
  0xe5   : > { %v576_v22 = vadd.f32 %v1407_v28, %v540_v12  ;;  %v584_v23 = vadd.f32 %v1407_v28, %v548_v13 }
  0xe6   : > { %v561_v10 = vadd.f32 %v1407_v28, %v525_v8  ;;  %v569_v11 = vadd.f32 %v1407_v28, %v533_v9 }
  0xe7   : > { %v608_v32 = vmax.f32 %v576_v22, 0.0  ;;  %v616_v33 = vmax.f32 %v584_v23, 0.0 }
  0xe8   : > { %v593_v16 = vmax.f32 %v561_v10, 0.0  ;;  %v601_v17 = vmax.f32 %v569_v11, 0.0 }
  0xea   : > { %v931_v18 = vpack.c.bf16 %v593_v16, %v592_v14  ;;  %v951_v19 = vpack.c.bf16 %v601_v17, %v600_v15  ;;  %v485_v20 = vpop.f32.mrf.mxu2  ;;  %v505_v21 = vpop.f32.mrf.mxu3 }
  0xeb   : > { %v541_v24 = vmul.f32 %v1401_v26, %v485_v20  ;;  %v549_v25 = vmul.f32 %v1401_v26, %v505_v21  ;;  %v448_v27 = vpop.f32.mrf.mxu0  ;;  %v468_v29 = vpop.f32.mrf.mxu1 }
  0xec   : > { %1003 = vst [vmem:[%s1424_s23 + $0x8] sm:$0xff] %v931_v18   ;;  %v526_v36 = vmul.f32 %v1401_v26, %v448_v27  ;;  %v534_v37 = vmul.f32 %v1401_v26, %v468_v29 }
  0xed   : > { %1007 = vst [vmem:[%s1424_s23 + $0x28] sm:$0xff] %v951_v19   ;;  %v577_v30 = vadd.f32 %v1407_v28, %v541_v24  ;;  %v585_v31 = vadd.f32 %v1407_v28, %v549_v25 }
  0xee   : > { %v562_v44 = vadd.f32 %v1407_v28, %v526_v36  ;;  %v570_v45 = vadd.f32 %v1407_v28, %v534_v37 }
  0xef   : > { %v609_v34 = vmax.f32 %v577_v30, 0.0  ;;  %v617_v35 = vmax.f32 %v585_v31, 0.0 }
  0xf0   : > { %v594_v52 = vmax.f32 %v562_v44, 0.0  ;;  %v602_v53 = vmax.f32 %v570_v45, 0.0 }
  0xf1   : > { %v971_v38 = vpack.c.bf16 %v609_v34, %v608_v32  ;;  %v991_v39 = vpack.c.bf16 %v617_v35, %v616_v33 }
  0xf2   : > { %v488_v40 = vpop.f32.mrf.mxu2  ;;  %v508_v41 = vpop.f32.mrf.mxu3 }
  0xf3   : > { %1011 = vst [vmem:[%s1424_s23 + $0x48] sm:$0xff] %v971_v38   ;;  %v450_v42 = vpop.f32.mrf.mxu0  ;;  %v470_v43 = vpop.f32.mrf.mxu1  ;;  %v542_v50 = vmul.f32 %v1401_v26, %v488_v40  ;;  %v550_v51 = vmul.f32 %v1401_v26, %v508_v41 }
  0xf4   : > { %1015 = vst [vmem:[%s1424_s23 + $0x68] sm:$0xff] %v991_v39   ;;  %v527_v46 = vmul.f32 %v1401_v26, %v450_v42  ;;  %v535_v47 = vmul.f32 %v1401_v26, %v470_v43 }
  0xf5   : > { %v578_v60 = vadd.f32 %v1407_v28, %v542_v50  ;;  %v586_v61 = vadd.f32 %v1407_v28, %v550_v51 }
  0xf6   : > { %v563_v48 = vadd.f32 %v1407_v28, %v527_v46  ;;  %v571_v49 = vadd.f32 %v1407_v28, %v535_v47 }
  0xf7   : > { %v610_v4 = vmax.f32 %v578_v60, 0.0  ;;  %v618_v5 = vmax.f32 %v586_v61, 0.0 }
  0xf8   : > { %v595_v54 = vmax.f32 %v563_v48, 0.0  ;;  %v603_v55 = vmax.f32 %v571_v49, 0.0 }
  0xfa   : > { %v936_v56 = vpack.c.bf16 %v595_v54, %v594_v52  ;;  %v956_v57 = vpack.c.bf16 %v603_v55, %v602_v53  ;;  %v490_v58 = vpop.f32.mrf.mxu2  ;;  %v510_v59 = vpop.f32.mrf.mxu3 }
  0xfb   : > { %v543_v62 = vmul.f32 %v1401_v26, %v490_v58  ;;  %v551_v63 = vmul.f32 %v1401_v26, %v510_v59  ;;  %v453_v0 = vpop.f32.mrf.mxu0  ;;  %v473_v1 = vpop.f32.mrf.mxu1 }
  0xfc   : > { %1004 = vst [vmem:[%s1424_s23 + $0x10] sm:$0xff] %v936_v56   ;;  %v528_v8 = vmul.f32 %v1401_v26, %v453_v0  ;;  %v536_v9 = vmul.f32 %v1401_v26, %v473_v1 }
  0xfd   : > { %1008 = vst [vmem:[%s1424_s23 + $0x30] sm:$0xff] %v956_v57   ;;  %v579_v2 = vadd.f32 %v1407_v28, %v543_v62  ;;  %v587_v3 = vadd.f32 %v1407_v28, %v551_v63 }
  0xfe   : > { %v564_v16 = vadd.f32 %v1407_v28, %v528_v8  ;;  %v572_v17 = vadd.f32 %v1407_v28, %v536_v9 }
  0xff   : > { %v611_v6 = vmax.f32 %v579_v2, 0.0  ;;  %v619_v7 = vmax.f32 %v587_v3, 0.0 }
 0x100   : > { %v596_v24 = vmax.f32 %v564_v16, 0.0  ;;  %v604_v25 = vmax.f32 %v572_v17, 0.0 }
 0x101   : > { %v976_v10 = vpack.c.bf16 %v611_v6, %v610_v4  ;;  %v996_v11 = vpack.c.bf16 %v619_v7, %v618_v5 }
 0x102   : > { %v493_v12 = vpop.f32.mrf.mxu2  ;;  %v513_v13 = vpop.f32.mrf.mxu3 }
 0x103   : > { %1012 = vst [vmem:[%s1424_s23 + $0x50] sm:$0xff] %v976_v10   ;;  %v455_v14 = vpop.f32.mrf.mxu0  ;;  %v475_v15 = vpop.f32.mrf.mxu1  ;;  %v544_v22 = vmul.f32 %v1401_v26, %v493_v12  ;;  %v552_v23 = vmul.f32 %v1401_v26, %v513_v13 }
 0x104   : > { %1016 = vst [vmem:[%s1424_s23 + $0x70] sm:$0xff] %v996_v11   ;;  %v529_v18 = vmul.f32 %v1401_v26, %v455_v14  ;;  %v537_v19 = vmul.f32 %v1401_v26, %v475_v15 }
 0x105   : > { %v580_v34 = vadd.f32 %v1407_v28, %v544_v22  ;;  %v588_v35 = vadd.f32 %v1407_v28, %v552_v23 }
 0x106   : > { %v565_v20 = vadd.f32 %v1407_v28, %v529_v18  ;;  %v573_v21 = vadd.f32 %v1407_v28, %v537_v19 }
 0x107   : > { %v612_v40 = vmax.f32 %v580_v34, 0.0  ;;  %v620_v41 = vmax.f32 %v588_v35, 0.0 }
 0x108   : > { %v597_v27 = vmax.f32 %v565_v20, 0.0  ;;  %v605_v29 = vmax.f32 %v573_v21, 0.0 }
 0x10a   : > { %v941_v30 = vpack.c.bf16 %v597_v27, %v596_v24  ;;  %v961_v31 = vpack.c.bf16 %v605_v29, %v604_v25  ;;  %v495_v32 = vpop.f32.mrf.mxu2  ;;  %v515_v33 = vpop.f32.mrf.mxu3 }
 0x10b   : > { %v545_v36 = vmul.f32 %v1401_v26, %v495_v32  ;;  %v553_v37 = vmul.f32 %v1401_v26, %v515_v33 }
 0x10c   : > { %1005 = vst [vmem:[%s1424_s23 + $0x18] sm:$0xff] %v941_v30  }
 0x10d   : > { %1009 = vst [vmem:[%s1424_s23 + $0x38] sm:$0xff] %v961_v31   ;;  %v581_v38 = vadd.f32 %v1407_v28, %v545_v36  ;;  %v589_v39 = vadd.f32 %v1407_v28, %v553_v37 }
 0x10f   : > { %v613_v42 = vmax.f32 %v581_v38, 0.0  ;;  %v621_v26 = vmax.f32 %v589_v39, 0.0 }
 0x111   : > { %v981_v43 = vpack.c.bf16 %v613_v42, %v612_v40  ;;  %v1001_v44 = vpack.c.bf16 %v621_v26, %v620_v41 }
 0x113   : > { %1013 = vst [vmem:[%s1424_s23 + $0x58] sm:$0xff] %v981_v43  }
 0x114   : > { %1017 = vst [vmem:[%s1424_s23 + $0x78] sm:$0xff] %v1001_v44  }
 0x115   : > { %1192 = shalt.err (!%p1189_p10)
}
 0x116   : > { %s1240_s10 = smov 64   ;;  %s1241_s30 = smov 4  }
 0x117   : > { %1048 = dma.vmem_to_hbm [thread:$0]  (%p1336_p3), %s700_s19, 2048, %s702_s13, %s687_s12, %s1240_s10, %s1240_s10, %s1241_s30  }
 0x118 PF: > { %s716_s5 = sand.u32 1, %s1223_s15   ;;  %p1536_p12 = scmp.ge.s32.totalorder %s1235_s18, 2 }
 0x119   : > { %s717_s23 = scalar_lea.sflag [#allocation4], %s716_s5 }
 0x11a   : > { %p1059_p13 = pnand %p1536_p12, %p1302_p6 }
 0x11c   : > { %p1060_p0 = pneg %p1059_p13 }
 0x11e   : > { %1218 = dma.done.wait (%p1060_p0), %s717_s23, 2048  }
 0x11f   : > { %1220 = vsyncadd (%p1060_p0), %s717_s23, 4294965248  ;;  %p18_p5 = scmp.ge.s32.totalorder %s1320_s29, 4   ;;  %s1537_s15 = smov %s1227_s16 }
 0x120   : > { %s1538_s16 = smov %s1231_s17  ;;  %s1539_s17 = smov %s1332_s8 }
 0x121   : > { %s1540_s18 = smov %s1320_s29  ;;  %20 = sbr.rel (!%p18_p5) target bundleno = 6 (0x6), region = 85 }
 0x126   :  { %723 = vsyncpa [#allocation3], 1 }
 0x127   :  { %725 = vsyncpa [#allocation3 + $0x1], 1 }
 0x128   :  { %726 = vsyncpa [#allocation6], 1 }
 0x129   :  { %727 = vsyncpa [#allocation4], 1 }
 0x12a   :  { %729 = vsyncpa [#allocation4 + $0x1], 1 }

</bundles_post_ra>
